<compile_context>
chip_gen: v6e
topology: v6e:2x2x1
jax: 0.10.0
libtpu: 0.0.40
codegen_flags: <defaults>
</compile_context>

<pallas_src>
import jax
import jax.numpy as jnp
from jax.experimental import pallas as pl
from jax.experimental.pallas import tpu as pltpu


# ---------------------------------------------------------------------------
# Kernel
# ---------------------------------------------------------------------------
def _fraclu_kernel(x_ref, slopes_ref, o_ref):
    x = x_ref[...]                     # (tile_r, tile_c)
    s = slopes_ref[...]                # (tile_r, 2): [:,0]=pos slope, [:,1]=neg
    pos_s = s[:, 0:1]                  # (tile_r, 1) -> broadcasts over lanes
    neg_s = s[:, 1:2]
    # Exact reference semantics (NaN -> 0, -0.0 -> +0.0 via the add).
    pos_part = jnp.where(x >= 0, pos_s * x, 0.0)
    neg_part = jnp.where(x < 0, neg_s * x, 0.0)
    o_ref[...] = (pos_part + neg_part).astype(o_ref.dtype)


# ---------------------------------------------------------------------------
# Tile picking
# ---------------------------------------------------------------------------
def _sublane_multiple(dtype) -> int:
    """Second-to-last block-dim multiple: 8 (f32), 16 (bf16/fp16), 32 (int8/fp8)."""
    itemsize = jnp.dtype(dtype).itemsize
    return max(8, 32 // max(1, itemsize))


def _pick_tiles(rows, cols, dtype, target_block_bytes, min_parallel_steps):
    """Pick a (tile_r, tile_c) block: lane-dense last dim, ~target_block_bytes.

    Block dims must be multiples of (sublane, 128) or equal the full extent.
    """
    sub = _sublane_multiple(dtype)
    elem = jnp.dtype(dtype).itemsize

    # Lane (last) axis: prefer the FULL extent whenever one sublane group of
    # full width fits the budget -- avoids a ragged, masked tail column.
    if cols <= 128 or sub * cols * elem <= target_block_bytes:
        tile_c = cols
    else:
        budget_c = target_block_bytes // (sub * elem)
        tile_c = max(128, (min(cols, budget_c) // 128) * 128)

    # Sublane (second-to-last) axis: dtype-aware multiple, or the full extent.
    max_r = max(sub, target_block_bytes // max(1, tile_c * elem))
    if rows <= max_r:
        tile_r = rows
    else:
        tile_r = max(sub, (max_r // sub) * sub)

    # Guarantee >= min_parallel_steps grid steps (v7x: 2 TCs need >= 2 steps
    # on a "parallel" axis).  Only split when rows can be cleanly halved.
    grid_steps = pl.cdiv(rows, tile_r) * pl.cdiv(cols, tile_c)
    if grid_steps < min_parallel_steps and rows >= 2 * sub:
        half = -(-rows // 2)
        tile_r_split = -(-half // sub) * sub
        if tile_r_split < rows:
            tile_r = tile_r_split

    return tile_r, tile_c


def _tpu_defaults():
    """(target_block_bytes, min_parallel_steps) per TPU generation."""
    try:
        kind = jax.devices()[0].device_kind.lower()
    except Exception:  # pragma: no cover - defensive
        kind = ""
    if "v7" in kind:
        return 4 << 20, 2        # 2 TCs/chip: want >=2 parallel grid steps
    if "v6" in kind:
        return 4 << 20, 1        # 32 MiB scoped default; 4 MiB blocks fine
    return 2 << 20, 1            # v5e / unknown: 16 MiB scoped-VMEM default


# ---------------------------------------------------------------------------
# Wrapper
# ---------------------------------------------------------------------------
def adaptive_fraclu_forward(x_nchw, pos_alpha, pos_beta, neg_alpha, neg_beta):
    """x_nchw: (N, C, H, W); alpha/beta params: (C,) each (rational slopes)."""
    N, C, H, W = x_nchw.shape
    rows, cols = N * C, H * W

    # Free, contiguous reshape: channel stays grouped per row, spatial on lanes.
    x2d = x_nchw.reshape(rows, cols)

    # Precompute rational slopes once (clamp_denominators=True).
    pos_slope = (pos_alpha.astype(jnp.float32)
                 / jnp.maximum(pos_beta.astype(jnp.float32), 1.0))
    neg_slope = (neg_alpha.astype(jnp.float32)
                 / jnp.maximum(neg_beta.astype(jnp.float32), 1.0))

    # Keep the in-kernel math in the activation dtype (bf16 VPU on v6e/v7x);
    # fall back to f32 for narrow / integer activations.
    if jnp.issubdtype(x2d.dtype, jnp.floating) and jnp.dtype(x2d.dtype).itemsize >= 2:
        slope_dtype = x2d.dtype
    else:
        slope_dtype = jnp.float32

    # Pack both slopes into a single (rows, 2) side input -> one DMA stream.
    slopes_c = jnp.stack([pos_slope, neg_slope], axis=-1).astype(slope_dtype)   # (C, 2)
    slopes_rows = jnp.broadcast_to(slopes_c[None, :, :], (N, C, 2)).reshape(rows, 2)

    target_bytes, min_par_steps = _tpu_defaults()
    tile_r, tile_c = _pick_tiles(rows, cols, x2d.dtype, target_bytes, min_par_steps)
    grid = (pl.cdiv(rows, tile_r), pl.cdiv(cols, tile_c))

    # TODO(synk): when the pre-activation is not needed downstream (pure
    # inference), pass input_output_aliases={0: 0} to reuse x2d's HBM buffer.
    out2d = pl.pallas_call(
        _fraclu_kernel,
        out_shape=jax.ShapeDtypeStruct((rows, cols), x2d.dtype),
        grid_spec=pltpu.PrefetchScalarGridSpec(
            num_scalar_prefetch=0,
            grid=grid,
            in_specs=[
                pl.BlockSpec((tile_r, tile_c), lambda i, j: (i, j)),
                pl.BlockSpec((tile_r, 2), lambda i, j: (i, 0)),
            ],
            out_specs=pl.BlockSpec((tile_r, tile_c), lambda i, j: (i, j)),
        ),
        compiler_params=pltpu.CompilerParams(
            dimension_semantics=("parallel", "parallel")),
    )(x2d, slopes_rows)

    return out2d.reshape(N, C, H, W)


# ---------------------------------------------------------------------------
# Pure-JAX reference (exact PyTorch forward semantics)
# ---------------------------------------------------------------------------
def _reference(x_nchw, pos_alpha, pos_beta, neg_alpha, neg_beta):
    pos_slope = (pos_alpha / jnp.maximum(pos_beta, 1.0)).reshape(1, -1, 1, 1)
    neg_slope = (neg_alpha / jnp.maximum(neg_beta, 1.0)).reshape(1, -1, 1, 1)
    pos_part = jnp.where(x_nchw >= 0, pos_slope * x_nchw, 0.0)
    neg_part = jnp.where(x_nchw < 0, neg_slope * x_nchw, 0.0)
    return pos_part + neg_part


if __name__ == "__main__":
    # Module defaults: init_pos_slope=1.0 -> Fraction(1,1); init_neg_slope=0.01
    # -> Fraction(1,100); slope_init_strategy='fixed'; channel_wise=True.
    N, C, H, W = 2, 4, 16, 16
    key = jax.random.PRNGKey(0)
    x = jax.random.normal(key, (N, C, H, W), dtype=jnp.float32)

    pos_alpha = jnp.full((C,), 1.0, dtype=jnp.float32)    # numerator of 1/1
    pos_beta = jnp.full((C,), 1.0, dtype=jnp.float32)     # denominator of 1/1
    neg_alpha = jnp.full((C,), 1.0, dtype=jnp.float32)    # numerator of 1/100
    neg_beta = jnp.full((C,), 100.0, dtype=jnp.float32)   # denominator of 1/100

    out = adaptive_fraclu_forward(x, pos_alpha, pos_beta, neg_alpha, neg_beta)
    out = jax.block_until_ready(out)

    ref = _reference(x, pos_alpha, pos_beta, neg_alpha, neg_beta)
    assert out.shape == x.shape and out.dtype == x.dtype
    assert jnp.allclose(out, ref, atol=1e-6, rtol=1e-6)

    # TODO(synk): the running activation-statistics / slope-adaptation
    # bookkeeping (Python-side mutable state fired every 100/1000 calls) is
    # host-side control flow and is not part of the per-call kernel.
    print("KERNEL_OK")
</pallas_src>

<mosaic_0001>
module attributes {stable_mosaic.version = 11 : i64} {
  func.func @_fraclu_kernel(%arg0: i32, %arg1: i32, %arg2: memref<8x256xf32, #tpu.memory_space<vmem>>, %arg3: memref<8x2xf32, #tpu.memory_space<vmem>>, %arg4: memref<8x256xf32, #tpu.memory_space<vmem>>) attributes {dimension_semantics = [#tpu.dimension_semantics<parallel>, #tpu.dimension_semantics<parallel>], iteration_bounds = array<i64: 1, 1>, scalar_prefetch = 0 : i64, scratch_operands = 0 : i64, tpu.core_type = #tpu.core_type<tc>, window_params = [{transform_indices = @transform_0, window_bounds = array<i64: 8, 256>}, {transform_indices = @transform_1, window_bounds = array<i64: 8, 2>}, {transform_indices = @transform_2, window_bounds = array<i64: 8, 256>}]} {
    %c0 = arith.constant 0 : index
    %c0_0 = arith.constant 0 : index
    %0 = vector.load %arg2[%c0, %c0_0] : memref<8x256xf32, #tpu.memory_space<vmem>>, vector<8x256xf32>
    %c0_1 = arith.constant 0 : index
    %c0_2 = arith.constant 0 : index
    %1 = vector.load %arg3[%c0_1, %c0_2] : memref<8x2xf32, #tpu.memory_space<vmem>>, vector<8x2xf32>
    %2 = vector.extract_strided_slice %1 {offsets = [0, 0], sizes = [8, 1], strides = [1, 1]} : vector<8x2xf32> to vector<8x1xf32>
    %3 = vector.extract_strided_slice %1 {offsets = [0, 1], sizes = [8, 1], strides = [1, 1]} : vector<8x2xf32> to vector<8x1xf32>
    %cst = arith.constant 0.000000e+00 : f32
    %4 = vector.broadcast %cst : f32 to vector<8x256xf32>
    %5 = arith.cmpf oge, %0, %4 : vector<8x256xf32>
    %6 = vector.broadcast %2 : vector<8x1xf32> to vector<8x256xf32>
    %7 = arith.mulf %6, %0 : vector<8x256xf32>
    %cst_3 = arith.constant 0.000000e+00 : f32
    %8 = vector.broadcast %cst_3 : f32 to vector<8x256xf32>
    %9 = arith.select %5, %7, %8 : vector<8x256xi1>, vector<8x256xf32>
    %cst_4 = arith.constant 0.000000e+00 : f32
    %10 = vector.broadcast %cst_4 : f32 to vector<8x256xf32>
    %11 = arith.cmpf olt, %0, %10 : vector<8x256xf32>
    %12 = vector.broadcast %3 : vector<8x1xf32> to vector<8x256xf32>
    %13 = arith.mulf %12, %0 : vector<8x256xf32>
    %cst_5 = arith.constant 0.000000e+00 : f32
    %14 = vector.broadcast %cst_5 : f32 to vector<8x256xf32>
    %15 = arith.select %11, %13, %14 : vector<8x256xi1>, vector<8x256xf32>
    %16 = arith.addf %9, %15 : vector<8x256xf32>
    %c0_6 = arith.constant 0 : index
    %c0_7 = arith.constant 0 : index
    %17 = vector.load %arg4[%c0_6, %c0_7] : memref<8x256xf32, #tpu.memory_space<vmem>>, vector<8x256xf32>
    tpu.vector_store %arg4[%c0_6, %c0_7], %16 {strides = array<i32>} : memref<8x256xf32, #tpu.memory_space<vmem>>, vector<8x256xf32>,
    return
  }
  func.func @transform_0(%arg0: i32, %arg1: i32) -> (i32, i32) {
    %c0_i32 = arith.constant 0 : i32
    return %arg0, %arg1 : i32, i32
  }
  func.func @transform_1(%arg0: i32, %arg1: i32) -> (i32, i32) {
    %c0_i32 = arith.constant 0 : i32
    %c0_i32_0 = arith.constant 0 : i32
    return %arg0, %c0_i32 : i32, i32
  }
  func.func @transform_2(%arg0: i32, %arg1: i32) -> (i32, i32) {
    %c0_i32 = arith.constant 0 : i32
    return %arg0, %arg1 : i32, i32
  }
}

</mosaic_0001>

<bundles_post_ra>
// kernel: tpu_custom_call.1
= control target key start
LH: loop header
LB: loop body
LE: loop exit
PB: predicated region body
PF: predicated region fallthrough
CT: control target
= control target key end

     0   :  { %7 = vsyncpa [#allocation3], 0  ;;  %s145_s0 = inlined_call_operand.hbm [shape: f32[8,256], index: 0, kind: input, shape index: {}]   ;;  %s146_s1 = inlined_call_operand.vmem [shape: f32[8,2], index: 1, kind: input, shape index: {}]   ;;  %s147_s2 = inlined_call_operand.hbm [shape: f32[8,256], index: 2, kind: output, shape index: {}]  }
   0x1   :  { %8 = vsyncpa [#allocation4], 0  ;;  %s117_s9 = smov [#allocation2]  }
   0x2   :  { %s15_s10 = sshll.u32 %s117_s9, 4  ;;  %s16_s10 = int_to_ptr.vmem [resolvable:$true] %s15_s10 }
   0x3   :  { %s81_s11 = scalar_lea.vmem %s16_s10, 256  ;;  %p86_p1 = scmp.lt.s32.totalorder %s16_s10, %s16_s10 }
   0x4   :  { %p82_p0 = scmp.ne.s32.totalorder %s16_s10, %s81_s11  ;;  %p87_p2 = scmp.lt.s32.totalorder %s81_s11, %s81_s11 }
   0x6   :  { %p88_p3 = por %p87_p2, %p86_p1 }
   0x8   :  { %p89_p4 = pnand %p88_p3, %p82_p0 }
   0xa   :  { %92 = shalt.err (!%p89_p4)
}
   0xb   :  { %18 = dma.hbm_to_vmem [thread:$0]  %s145_s0, 256, %s16_s10, [#allocation3]  }
   0xc   :  { %113 = dma.done.wait [#allocation3], 256  }
   0xd   :  { %114 = vsyncadd [#allocation3], 4294967040  ;;  %v118_v0 = vmov 0   ;;  %v26_v1 = vld [vmem:[%s146_s1] sm:$0xff]  ;;  %v119_v2 = vmov 1   ;;  %v25_v5 = vld [vmem:[#allocation2 + $0x8] sm:$0xff] }
   0xe   :  { %71 = vset.pattern.permute.xlu0 %v118_v0  ;;  %v24_v4 = vld [vmem:[#allocation2] sm:$0xff]  ;;  %vm28_vm1 = vcmp.ge.f32.partialorder %v25_v5, 0.0  ;;  %vm39_vm3 = vcmp.lt.f32.partialorder %v25_v5, 0.0  ;;  %s120_s0 = smov [#allocation5]  }
   0xf   :  { %31 = vperm.xlu0 %71, %v26_v1   ;;  %vm27_vm0 = vcmp.ge.f32.partialorder %v24_v4, 0.0  ;;  %vm38_vm2 = vcmp.lt.f32.partialorder %v24_v4, 0.0  ;;  %s58_s16 = sshll.u32 %s120_s0, 4  ;;  %s59_s16 = int_to_ptr.vmem [resolvable:$true] %s58_s16 }
  0x10   :  { %s93_s1 = scalar_lea.vmem %s59_s16, 256  ;;  %p98_p6 = scmp.lt.s32.totalorder %s59_s16, %s59_s16 }
  0x11   :  { %p94_p5 = scmp.ne.s32.totalorder %s59_s16, %s93_s1  ;;  %p99_p7 = scmp.lt.s32.totalorder %s93_s1, %s93_s1 }
  0x13   :  { %72 = vset.pattern.permute.xlu0 %v119_v2  ;;  %p100_p8 = por %p99_p7, %p98_p6 }
  0x14   :  { %41 = vperm.xlu0 %72, %v26_v1  }
  0x15   :  { %p101_p9 = pnand %p100_p8, %p94_p5 }
  0x8a   :  { %v32_v3 = vpop.permute.xlu0 %31 }
  0x8b   :  { %v34_v6 = vmul.f32 %v32_v3, %v24_v4  ;;  %v35_v7 = vmul.f32 %v32_v3, %v25_v5 }
  0x8d   :  { %v36_v11 = vsel %vm27_vm0, %v34_v6, 0.0  ;;  %v37_v12 = vsel %vm28_vm1, %v35_v7, 0.0 }
  0x8f   :  { %v42_v8 = vpop.permute.xlu0 %41 }
  0x90   :  { %v44_v9 = vmul.f32 %v42_v8, %v24_v4  ;;  %v45_v10 = vmul.f32 %v42_v8, %v25_v5 }
  0x92   :  { %v46_v13 = vsel %vm38_vm2, %v44_v9, 0.0  ;;  %v47_v14 = vsel %vm39_vm3, %v45_v10, 0.0 }
  0x93   :  { %v48_v15 = vadd.f32 %v46_v13, %v36_v11  ;;  %v49_v16 = vadd.f32 %v47_v14, %v37_v12 }
  0x95   :  { %50 = vst [vmem:[#allocation5] sm:$0xff] %v48_v15  ;;  %51 = vst [vmem:[#allocation5 + $0x8] sm:$0xff] %v49_v16 }
  0x96   :  { %104 = shalt.err (!%p101_p9)
}
  0x97   :  { %61 = dma.vmem_to_hbm [thread:$0]  %s59_s16, 256, %s147_s2, [#allocation4]  }
  0x98   :  { %115 = dma.done.wait [#allocation4], 256  }
  0x99   :  { %116 = vsyncadd [#allocation4], 4294967040 }
  0x9a   :  { %65 = vsyncpa [#allocation3], 1 }
  0x9b   :  { %66 = vsyncpa [#allocation4], 1 }

</bundles_post_ra>
